<compile_context>
chip_gen: v7x
topology: tpu7x:2x2x1
jax: 0.10.0
libtpu: 0.0.40
codegen_flags: <defaults>
</compile_context>

<pallas_src>
import functools

import jax
import jax.numpy as jnp
from jax.experimental import pallas as pl
from jax.experimental.pallas import tpu as pltpu


def _vae_kernel(x_ref, eps_ref,
                w1_ref, b1_ref,
                wmulv_ref, bmulv_ref,
                w2_ref, b2_ref,
                wo_ref, bo_ref,
                out_ref, mulv_ref):
    latent_dim = eps_ref.shape[-1]

    x = x_ref[...]                                              # (TB, D_in)

    # --- encode: fc1 + relu ---
    h = jnp.dot(x, w1_ref[...], preferred_element_type=jnp.float32) + b1_ref[...]
    h = jnp.maximum(h, 0.0)                                     # (TB, H)

    # --- fused mu/logvar projection (single MXU pass, 2L lanes wide) ---
    mulv = (jnp.dot(h, wmulv_ref[...], preferred_element_type=jnp.float32)
            + bmulv_ref[...])                                   # (TB, 2L)
    mu = mulv[:, :latent_dim]
    logvar = mulv[:, latent_dim:]

    # --- reparameterize ---
    std = jnp.exp(0.5 * logvar)
    z = mu + eps_ref[...] * std                                 # (TB, L)

    # --- decode: fc2 + relu ---
    h2 = jnp.dot(z, w2_ref[...], preferred_element_type=jnp.float32) + b2_ref[...]
    h2 = jnp.maximum(h2, 0.0)                                   # (TB, H)

    # --- fc_out as VPU multiply + lane reduce (no 1-column MXU pass) ---
    out = jnp.sum(h2 * wo_ref[...], axis=-1, keepdims=True) + bo_ref[...]

    out_ref[...] = out                                          # (TB, 1)
    mulv_ref[...] = mulv                                        # (TB, 2L)


def _round_up(n: int, m: int) -> int:
    return ((n + m - 1) // m) * m


@functools.partial(jax.jit, static_argnames=("tile_b_max",))
def single_vae_classifier_forward(x, eps, params, *, tile_b_max=1024):
    """Full VAE-classifier forward in one batch-tiled Pallas call.

    x:   (B, input_dim) float32
    eps: (B, latent_dim) float32 standard-normal noise (torch.randn_like eq.)
    params: dict with w1,b1,w_mu,b_mu,w_logvar,b_logvar,w2,b2,w_out,b_out
            (weights stored as (in_features, out_features)).
    Returns (out (B,1), mu (B,L), logvar (B,L)).
    """
    B, input_dim = x.shape
    hidden_dim = params["w1"].shape[1]
    latent_dim = params["w_mu"].shape[1]

    # Fuse mu/logvar weights & biases (cheap, one-time XLA concat).
    w_mulv = jnp.concatenate([params["w_mu"], params["w_logvar"]], axis=1)   # (H, 2L)
    b_mulv = jnp.concatenate([params["b_mu"], params["b_logvar"]], axis=1)   # (1, 2L)
    # fc_out weight as a broadcastable row for the VPU reduction.
    wo_row = params["w_out"].reshape(1, hidden_dim)                          # (1, H)
    bo = params["b_out"].reshape(1, 1)                                       # (1, 1)

    # Pick a batch tile and pad B so the grid divides evenly.
    tile_b = min(tile_b_max, _round_up(B, 8))
    b_pad = _round_up(B, tile_b)
    if b_pad != B:
        x = jnp.pad(x, ((0, b_pad - B), (0, 0)))
        eps = jnp.pad(eps, ((0, b_pad - B), (0, 0)))
    grid = (b_pad // tile_b,)

    def batch_map(i):
        return (i, 0)

    def const_map(i):
        return (0, 0)

    in_specs = [
        pl.BlockSpec((tile_b, input_dim), batch_map),        # x
        pl.BlockSpec((tile_b, latent_dim), batch_map),       # eps
        pl.BlockSpec((input_dim, hidden_dim), const_map),    # w1 (resident)
        pl.BlockSpec((1, hidden_dim), const_map),            # b1
        pl.BlockSpec((hidden_dim, 2 * latent_dim), const_map),  # w_mulv
        pl.BlockSpec((1, 2 * latent_dim), const_map),        # b_mulv
        pl.BlockSpec((latent_dim, hidden_dim), const_map),   # w2
        pl.BlockSpec((1, hidden_dim), const_map),            # b2
        pl.BlockSpec((1, hidden_dim), const_map),            # w_out row
        pl.BlockSpec((1, 1), const_map),                     # b_out
    ]
    out_specs = (
        pl.BlockSpec((tile_b, 1), batch_map),                # logit
        pl.BlockSpec((tile_b, 2 * latent_dim), batch_map),   # mu || logvar
    )
    out_shapes = (
        jax.ShapeDtypeStruct((b_pad, 1), jnp.float32),
        jax.ShapeDtypeStruct((b_pad, 2 * latent_dim), jnp.float32),
    )

    out_pad, mulv_pad = pl.pallas_call(
        _vae_kernel,
        out_shape=out_shapes,
        grid=grid,
        in_specs=in_specs,
        out_specs=out_specs,
        compiler_params=pltpu.CompilerParams(
            dimension_semantics=("parallel",)),
    )(x, eps, w1 := params["w1"], params["b1"], w_mulv, b_mulv,
      params["w2"], params["b2"], wo_row, bo)

    out = out_pad[:B]
    mu = mulv_pad[:B, :latent_dim]
    logvar = mulv_pad[:B, latent_dim:]
    return out, mu, logvar


def init_params(key, input_dim, latent_dim=16, hidden_dim=128):
    """Synthetic init mirroring nn.Linear shapes; weights are (in, out)."""
    ks = jax.random.split(key, 10)

    def lin(kw, kb, fan_in, fan_out):
        bound = 1.0 / jnp.sqrt(fan_in)
        w = jax.random.uniform(kw, (fan_in, fan_out), jnp.float32, -bound, bound)
        b = jax.random.uniform(kb, (1, fan_out), jnp.float32, -bound, bound)
        return w, b

    w1, b1 = lin(ks[0], ks[1], input_dim, hidden_dim)
    w_mu, b_mu = lin(ks[2], ks[3], hidden_dim, latent_dim)
    w_lv, b_lv = lin(ks[4], ks[5], hidden_dim, latent_dim)
    w2, b2 = lin(ks[6], ks[7], latent_dim, hidden_dim)
    w_out, b_out = lin(ks[8], ks[9], hidden_dim, 1)

    return {
        "w1": w1, "b1": b1,
        "w_mu": w_mu, "b_mu": b_mu,
        "w_logvar": w_lv, "b_logvar": b_lv,
        "w2": w2, "b2": b2,
        "w_out": w_out, "b_out": b_out,
    }


def _reference_forward(x, eps, p):
    h = jnp.maximum(x @ p["w1"] + p["b1"], 0.0)
    mu = h @ p["w_mu"] + p["b_mu"]
    logvar = h @ p["w_logvar"] + p["b_logvar"]
    z = mu + eps * jnp.exp(0.5 * logvar)
    h2 = jnp.maximum(z @ p["w2"] + p["b2"], 0.0)
    out = h2 @ p["w_out"] + p["b_out"]
    return out, mu, logvar


if __name__ == "__main__":
    key = jax.random.PRNGKey(0)
    k_param, k_x, k_eps = jax.random.split(key, 3)

    batch = 8
    input_dim = 32
    latent_dim = 16
    hidden_dim = 128

    params = init_params(k_param, input_dim, latent_dim, hidden_dim)
    x = jax.random.normal(k_x, (batch, input_dim), jnp.float32)
    eps = jax.random.normal(k_eps, (batch, latent_dim), jnp.float32)

    out, mu, logvar = single_vae_classifier_forward(x, eps, params)
    jax.block_until_ready((out, mu, logvar))

    # sanity check against a pure-JAX reference
    ref_out, ref_mu, ref_lv = _reference_forward(x, eps, params)
    assert out.shape == (batch, 1)
    assert mu.shape == (batch, latent_dim)
    assert logvar.shape == (batch, latent_dim)
    assert jnp.allclose(mu, ref_mu, atol=1e-5)
    assert jnp.allclose(logvar, ref_lv, atol=1e-5)
    assert jnp.allclose(out, ref_out, atol=1e-4)

    print("KERNEL_OK")
</pallas_src>

<mosaic_0001>
module attributes {stable_mosaic.version = 11 : i64} {
  func.func @_vae_kernel(%arg0: i32, %arg1: memref<8x32xf32, #tpu.memory_space<vmem>>, %arg2: memref<8x16xf32, #tpu.memory_space<vmem>>, %arg3: memref<32x128xf32, #tpu.memory_space<vmem>>, %arg4: memref<1x128xf32, #tpu.memory_space<vmem>>, %arg5: memref<128x32xf32, #tpu.memory_space<vmem>>, %arg6: memref<1x32xf32, #tpu.memory_space<vmem>>, %arg7: memref<16x128xf32, #tpu.memory_space<vmem>>, %arg8: memref<1x128xf32, #tpu.memory_space<vmem>>, %arg9: memref<1x128xf32, #tpu.memory_space<vmem>>, %arg10: memref<1x1xf32, #tpu.memory_space<vmem>>, %arg11: memref<8x1xf32, #tpu.memory_space<vmem>>, %arg12: memref<8x32xf32, #tpu.memory_space<vmem>>) attributes {dimension_semantics = [#tpu.dimension_semantics<parallel>], iteration_bounds = array<i64: 1>, scalar_prefetch = 0 : i64, scratch_operands = 0 : i64, tpu.core_type = #tpu.core_type<tc>, window_params = [{transform_indices = @transform_0, window_bounds = array<i64: 8, 32>}, {transform_indices = @transform_1, window_bounds = array<i64: 8, 16>}, {pipeline_mode = #tpu.pipeline_mode<synchronous>, transform_indices = @transform_2, window_bounds = array<i64: 32, 128>}, {pipeline_mode = #tpu.pipeline_mode<synchronous>, transform_indices = @transform_3, window_bounds = array<i64: 1, 128>}, {pipeline_mode = #tpu.pipeline_mode<synchronous>, transform_indices = @transform_4, window_bounds = array<i64: 128, 32>}, {pipeline_mode = #tpu.pipeline_mode<synchronous>, transform_indices = @transform_5, window_bounds = array<i64: 1, 32>}, {pipeline_mode = #tpu.pipeline_mode<synchronous>, transform_indices = @transform_6, window_bounds = array<i64: 16, 128>}, {pipeline_mode = #tpu.pipeline_mode<synchronous>, transform_indices = @transform_7, window_bounds = array<i64: 1, 128>}, {pipeline_mode = #tpu.pipeline_mode<synchronous>, transform_indices = @transform_8, window_bounds = array<i64: 1, 128>}, {pipeline_mode = #tpu.pipeline_mode<synchronous>, transform_indices = @transform_9, window_bounds = array<i64: 1, 1>}, {transform_indices = @transform_10, window_bounds = array<i64: 8, 1>}, {transform_indices = @transform_11, window_bounds = array<i64: 8, 32>}]} {
    %c0 = arith.constant 0 : index
    %c0_0 = arith.constant 0 : index
    %0 = vector.load %arg1[%c0, %c0_0] : memref<8x32xf32, #tpu.memory_space<vmem>>, vector<8x32xf32>
    %c0_1 = arith.constant 0 : index
    %c0_2 = arith.constant 0 : index
    %1 = vector.load %arg3[%c0_1, %c0_2] : memref<32x128xf32, #tpu.memory_space<vmem>>, vector<32x128xf32>
    %cst = arith.constant dense<0.000000e+00> : vector<8x128xf32>
    %2 = tpu.matmul %0, %1, %cst {dimension_numbers = #tpu.dot_dimension_numbers<[1], [0], [0], [1], [0, 0, 1, 1], [], []>} : vector<8x32xf32>, vector<32x128xf32>, vector<8x128xf32> -> vector<8x128xf32>
    %c0_3 = arith.constant 0 : index
    %c0_4 = arith.constant 0 : index
    %3 = vector.load %arg4[%c0_3, %c0_4] : memref<1x128xf32, #tpu.memory_space<vmem>>, vector<1x128xf32>
    %4 = vector.broadcast %3 : vector<1x128xf32> to vector<8x128xf32>
    %5 = arith.addf %2, %4 : vector<8x128xf32>
    %cst_5 = arith.constant 0.000000e+00 : f32
    %6 = vector.broadcast %cst_5 : f32 to vector<8x128xf32>
    %7 = arith.maximumf %5, %6 : vector<8x128xf32>
    %c0_6 = arith.constant 0 : index
    %c0_7 = arith.constant 0 : index
    %8 = vector.load %arg5[%c0_6, %c0_7] : memref<128x32xf32, #tpu.memory_space<vmem>>, vector<128x32xf32>
    %cst_8 = arith.constant dense<0.000000e+00> : vector<8x32xf32>
    %9 = tpu.matmul %7, %8, %cst_8 {dimension_numbers = #tpu.dot_dimension_numbers<[1], [0], [0], [1], [0, 0, 1, 1], [], []>} : vector<8x128xf32>, vector<128x32xf32>, vector<8x32xf32> -> vector<8x32xf32>
    %c0_9 = arith.constant 0 : index
    %c0_10 = arith.constant 0 : index
    %10 = vector.load %arg6[%c0_9, %c0_10] : memref<1x32xf32, #tpu.memory_space<vmem>>, vector<1x32xf32>
    %11 = vector.broadcast %10 : vector<1x32xf32> to vector<8x32xf32>
    %12 = arith.addf %9, %11 : vector<8x32xf32>
    %13 = vector.extract_strided_slice %12 {offsets = [0, 0], sizes = [8, 16], strides = [1, 1]} : vector<8x32xf32> to vector<8x16xf32>
    %14 = vector.extract_strided_slice %12 {offsets = [0, 16], sizes = [8, 16], strides = [1, 1]} : vector<8x32xf32> to vector<8x16xf32>
    %cst_11 = arith.constant 5.000000e-01 : f32
    %15 = vector.broadcast %cst_11 : f32 to vector<8x16xf32>
    %16 = arith.mulf %15, %14 : vector<8x16xf32>
    %17 = math.exp %16 : vector<8x16xf32>
    %c0_12 = arith.constant 0 : index
    %c0_13 = arith.constant 0 : index
    %18 = vector.load %arg2[%c0_12, %c0_13] : memref<8x16xf32, #tpu.memory_space<vmem>>, vector<8x16xf32>
    %19 = arith.mulf %18, %17 : vector<8x16xf32>
    %20 = arith.addf %13, %19 : vector<8x16xf32>
    %c0_14 = arith.constant 0 : index
    %c0_15 = arith.constant 0 : index
    %21 = vector.load %arg7[%c0_14, %c0_15] : memref<16x128xf32, #tpu.memory_space<vmem>>, vector<16x128xf32>
    %cst_16 = arith.constant dense<0.000000e+00> : vector<8x128xf32>
    %22 = tpu.matmul %20, %21, %cst_16 {dimension_numbers = #tpu.dot_dimension_numbers<[1], [0], [0], [1], [0, 0, 1, 1], [], []>} : vector<8x16xf32>, vector<16x128xf32>, vector<8x128xf32> -> vector<8x128xf32>
    %c0_17 = arith.constant 0 : index
    %c0_18 = arith.constant 0 : index
    %23 = vector.load %arg8[%c0_17, %c0_18] : memref<1x128xf32, #tpu.memory_space<vmem>>, vector<1x128xf32>
    %24 = vector.broadcast %23 : vector<1x128xf32> to vector<8x128xf32>
    %25 = arith.addf %22, %24 : vector<8x128xf32>
    %cst_19 = arith.constant 0.000000e+00 : f32
    %26 = vector.broadcast %cst_19 : f32 to vector<8x128xf32>
    %27 = arith.maximumf %25, %26 : vector<8x128xf32>
    %c0_20 = arith.constant 0 : index
    %c0_21 = arith.constant 0 : index
    %28 = vector.load %arg9[%c0_20, %c0_21] : memref<1x128xf32, #tpu.memory_space<vmem>>, vector<1x128xf32>
    %29 = vector.broadcast %28 : vector<1x128xf32> to vector<8x128xf32>
    %30 = arith.mulf %27, %29 : vector<8x128xf32>
    %cst_22 = arith.constant dense<0.000000e+00> : vector<8xf32>
    %31 = vector.multi_reduction <add>, %30, %cst_22 [1] : vector<8x128xf32> to vector<8xf32>
    %32 = vector.shape_cast %31 : vector<8xf32> to vector<8x1xf32>
    %c0_23 = arith.constant 0 : index
    %c0_24 = arith.constant 0 : index
    %33 = vector.load %arg10[%c0_23, %c0_24] : memref<1x1xf32, #tpu.memory_space<vmem>>, vector<1x1xf32>
    %34 = vector.broadcast %33 : vector<1x1xf32> to vector<8x1xf32>
    %35 = arith.addf %32, %34 : vector<8x1xf32>
    %c0_25 = arith.constant 0 : index
    %c0_26 = arith.constant 0 : index
    %36 = vector.load %arg11[%c0_25, %c0_26] : memref<8x1xf32, #tpu.memory_space<vmem>>, vector<8x1xf32>
    tpu.vector_store %arg11[%c0_25, %c0_26], %35 {strides = array<i32>} : memref<8x1xf32, #tpu.memory_space<vmem>>, vector<8x1xf32>,
    %c0_27 = arith.constant 0 : index
    %c0_28 = arith.constant 0 : index
    %37 = vector.load %arg12[%c0_27, %c0_28] : memref<8x32xf32, #tpu.memory_space<vmem>>, vector<8x32xf32>
    tpu.vector_store %arg12[%c0_27, %c0_28], %12 {strides = array<i32>} : memref<8x32xf32, #tpu.memory_space<vmem>>, vector<8x32xf32>,
    return
  }
  func.func @transform_0(%arg0: i32) -> (i32, i32) {
    %c0_i32 = arith.constant 0 : i32
    %c0_i32_0 = arith.constant 0 : i32
    return %arg0, %c0_i32 : i32, i32
  }
  func.func @transform_1(%arg0: i32) -> (i32, i32) {
    %c0_i32 = arith.constant 0 : i32
    %c0_i32_0 = arith.constant 0 : i32
    return %arg0, %c0_i32 : i32, i32
  }
  func.func @transform_2(%arg0: i32) -> (i32, i32) {
    %c0_i32 = arith.constant 0 : i32
    %c0_i32_0 = arith.constant 0 : i32
    %c0_i32_1 = arith.constant 0 : i32
    return %c0_i32, %c0_i32_0 : i32, i32
  }
  func.func @transform_3(%arg0: i32) -> (i32, i32) {
    %c0_i32 = arith.constant 0 : i32
    %c0_i32_0 = arith.constant 0 : i32
    %c0_i32_1 = arith.constant 0 : i32
    return %c0_i32, %c0_i32_0 : i32, i32
  }
  func.func @transform_4(%arg0: i32) -> (i32, i32) {
    %c0_i32 = arith.constant 0 : i32
    %c0_i32_0 = arith.constant 0 : i32
    %c0_i32_1 = arith.constant 0 : i32
    return %c0_i32, %c0_i32_0 : i32, i32
  }
  func.func @transform_5(%arg0: i32) -> (i32, i32) {
    %c0_i32 = arith.constant 0 : i32
    %c0_i32_0 = arith.constant 0 : i32
    %c0_i32_1 = arith.constant 0 : i32
    return %c0_i32, %c0_i32_0 : i32, i32
  }
  func.func @transform_6(%arg0: i32) -> (i32, i32) {
    %c0_i32 = arith.constant 0 : i32
    %c0_i32_0 = arith.constant 0 : i32
    %c0_i32_1 = arith.constant 0 : i32
    return %c0_i32, %c0_i32_0 : i32, i32
  }
  func.func @transform_7(%arg0: i32) -> (i32, i32) {
    %c0_i32 = arith.constant 0 : i32
    %c0_i32_0 = arith.constant 0 : i32
    %c0_i32_1 = arith.constant 0 : i32
    return %c0_i32, %c0_i32_0 : i32, i32
  }
  func.func @transform_8(%arg0: i32) -> (i32, i32) {
    %c0_i32 = arith.constant 0 : i32
    %c0_i32_0 = arith.constant 0 : i32
    %c0_i32_1 = arith.constant 0 : i32
    return %c0_i32, %c0_i32_0 : i32, i32
  }
  func.func @transform_9(%arg0: i32) -> (i32, i32) {
    %c0_i32 = arith.constant 0 : i32
    %c0_i32_0 = arith.constant 0 : i32
    %c0_i32_1 = arith.constant 0 : i32
    return %c0_i32, %c0_i32_0 : i32, i32
  }
  func.func @transform_10(%arg0: i32) -> (i32, i32) {
    %c0_i32 = arith.constant 0 : i32
    %c0_i32_0 = arith.constant 0 : i32
    return %arg0, %c0_i32 : i32, i32
  }
  func.func @transform_11(%arg0: i32) -> (i32, i32) {
    %c0_i32 = arith.constant 0 : i32
    %c0_i32_0 = arith.constant 0 : i32
    return %arg0, %c0_i32 : i32, i32
  }
}

</mosaic_0001>

<bundles_post_ra>
// kernel: single_vae_classifier_forward.1
= control target key start
LH: loop header
LB: loop body
LE: loop exit
PB: predicated region body
PF: predicated region fallthrough
CT: control target
= control target key end

     0   :  { %v466_v0 = vmov 0.0|0.0   ;;  %vm467_vm0 = vmmov 0   ;;  %v468_v4 = vmov 0.0   ;;  %vm51_vm1 = vcmask 261120   ;;  %s628_s2 = inlined_call_operand.vmem [shape: f32[32,128], index: 2, kind: input, shape index: {}]   ;;  %s629_s4 = inlined_call_operand.vmem [shape: f32[128,32], index: 4, kind: input, shape index: {}]   ;;  %s630_s0 = inlined_call_operand.vmem [shape: f32[8,32], index: 0, kind: input, shape index: {}]   ;;  %s631_s3 = inlined_call_operand.vmem [shape: f32[1,128], index: 3, kind: input, shape index: {}]   ;;  %s632_s5 = inlined_call_operand.vmem [shape: f32[1,32], index: 5, kind: input, shape index: {}]   ;;  %s633_s11 = inlined_call_operand.vmem [shape: f32[8,32], index: 11, kind: output, shape index: {1}]   ;;  %s634_s6 = inlined_call_operand.vmem [shape: f32[16,128], index: 6, kind: input, shape index: {}]   ;;  %s635_s1 = inlined_call_operand.vmem [shape: f32[8,16], index: 1, kind: input, shape index: {}]   ;;  %s636_s9 = inlined_call_operand.<no memory space> [shape: f32[1,1], index: 9, kind: input, shape index: {}]   ;;  %s637_s7 = inlined_call_operand.vmem [shape: f32[1,128], index: 7, kind: input, shape index: {}]   ;;  %s638_s8 = inlined_call_operand.vmem [shape: f32[1,128], index: 8, kind: input, shape index: {}]   ;;  %s639_s10 = inlined_call_operand.vmem [shape: f32[8,1], index: 10, kind: output, shape index: {0}]  }
   0x1   :  { %427 = vmatprep.subr.bf16.mxu0 %v466_v0  ;;  %v40_v1 = vld [vmem:[%s628_s2] sm:$0xff]  ;;  %v41_v2 = vld [vmem:[%s628_s2 + $0x8] sm:$0xff]  ;;  %v42_v3 = vld [vmem:[%s628_s2 + $0x10] sm:$0xff]  ;;  %382 = vmatprep.mubr.msk.f32.mxu0 %vm467_vm0, %v468_v4  ;;  %vm238_vm2 = vcmask 130048   ;;  %v17_v52 = vstv %s636_s9  ;;  %vm331_vm3 = vcmask 7168  }
   0x2   :  { %v428_v5 = vpack.c.bf16 %v41_v2, %v40_v1  ;;  %v43_v6 = vld [vmem:[%s628_s2 + $0x18] sm:$0xff]  ;;  %433 = vmatprep.subr.bf16.mxu1 %v466_v0  ;;  %v126_v7 = vld [vmem:[%s629_s4] sm:$0xff]  ;;  %417 = vmatprep.mubr.msk.f32.mxu1 %vm467_vm0, %v468_v4  ;;  %v127_v8 = vld [vmem:[%s629_s4 + $0x8] sm:$0xff]  ;;  %18 = vst [vmem:[#allocation2] sm:$0x1] %v17_v52 }
   0x3   :  { %v128_v9 = vld [vmem:[%s629_s4 + $0x10] sm:$0xff]  ;;  %v129_v10 = vld [vmem:[%s629_s4 + $0x18] sm:$0xff]  ;;  %v431_v11 = vpack.c.bf16 %v43_v6, %v42_v3  ;;  %v434_v12 = vpack.c.bf16 %v127_v8, %v126_v7  ;;  %v130_v14 = vld [vmem:[%s629_s4 + $0x20] sm:$0xff] }
   0x4   :  { %429 = vmatpush3.bf16.msra.mxu0 %v428_v5  ;;  %v437_v13 = vpack.c.bf16 %v129_v10, %v128_v9  ;;  %v131_v15 = vld [vmem:[%s629_s4 + $0x28] sm:$0xff]  ;;  %v39_v16 = vld [vmem:[%s630_s0] sm:$0xff]  ;;  %v132_v18 = vld [vmem:[%s629_s4 + $0x30] sm:$0xff] }
   0x5   :  { %430 = vmatprep.subr.bf16.mxu0 %v466_v0  ;;  %435 = vmatpush3.bf16.msra.mxu1 %v434_v12  ;;  %v440_v17 = vpack.c.bf16 %v131_v15, %v130_v14  ;;  %v133_v19 = vld [vmem:[%s629_s4 + $0x38] sm:$0xff]  ;;  %v134_v21 = vld [vmem:[%s629_s4 + $0x40] sm:$0xff]  ;;  %v135_v22 = vld [vmem:[%s629_s4 + $0x48] sm:$0xff] }
   0x6   :  { %436 = vmatprep.subr.bf16.mxu1 %v466_v0  ;;  %v443_v20 = vpack.c.bf16 %v133_v19, %v132_v18  ;;  %v446_v23 = vpack.c.bf16 %v135_v22, %v134_v21  ;;  %v136_v24 = vld [vmem:[%s629_s4 + $0x50] sm:$0xff]  ;;  %v137_v25 = vld [vmem:[%s629_s4 + $0x58] sm:$0xff]  ;;  %v138_v27 = vld [vmem:[%s629_s4 + $0x60] sm:$0xff] }
   0x7   :  { %v449_v26 = vpack.c.bf16 %v137_v25, %v136_v24  ;;  %v139_v28 = vld [vmem:[%s629_s4 + $0x68] sm:$0xff]  ;;  %v140_v30 = vld [vmem:[%s629_s4 + $0x70] sm:$0xff]  ;;  %v141_v31 = vld [vmem:[%s629_s4 + $0x78] sm:$0xff] }
   0x8   :  { %432 = vmatpush3.bf16.msra.mxu0 %v431_v11  ;;  %v452_v29 = vpack.c.bf16 %v139_v28, %v138_v27  ;;  %v455_v32 = vpack.c.bf16 %v141_v31, %v140_v30  ;;  %v342_v33 = vld [vmem:[%s631_s3] ss:$0 sm:$0xff]  ;;  %v230_v44 = vld [vmem:[%s634_s6 + $0x8] sm:$0xff] }
   0x9   :  { %457 = vmatprep.subr.bf16.mxu0 %v466_v0  ;;  %438 = vmatpush3.bf16.msra.mxu1 %v437_v13  ;;  %v344_v38 = vld [vmem:[%s632_s5] ss:$0 sm:$0xff]  ;;  %s469_s5 = smov 112  }
   0xa   :  { %439 = vmatprep.subr.bf16.mxu1 %v466_v0  ;;  %v229_v43 = vld [vmem:[%s634_s6] sm:$0xff] }
   0xb   :  { %383 = vmatmul.mubr.msk.f32.vlgmr.msra.gmra.mrb[0].mxu0 %vm51_vm1, %v39_v16  ;;  %v458_v45 = vpack.c.bf16 %v230_v44, %v229_v43  ;;  %v222_v48 = vld [vmem:[%s635_s1] sm:$0xff] }
   0xc   :  { %424 = vmatprep.mubr.msk.f32.mxu0 %vm467_vm0, %v468_v4  ;;  %v345_v53 = vld [vmem:[%s637_s7] ss:$0 sm:$0xff] }
   0xd   :  { %441 = vmatpush3.bf16.msra.mxu1 %v440_v17  ;;  %459 = vmatpush3.bf16.msra.mxu0 %v458_v45  ;;  %v347_v57 = vld [vmem:[%s638_s8] ss:$0 sm:$0xff] }
   0xe   :  { %442 = vmatprep.subr.bf16.mxu1 %v466_v0  ;;  %v348_v60 = vld [vmem:[#allocation2] ss:$0 sm:$0xff] }
  0x11   :  { %444 = vmatpush3.bf16.msra.mxu1 %v443_v20 }
  0x12   :  { %445 = vmatprep.subr.bf16.mxu1 %v466_v0 }
  0x15   :  { %447 = vmatpush3.bf16.msra.mxu1 %v446_v23 }
  0x16   :  { %448 = vmatprep.subr.bf16.mxu1 %v466_v0 }
  0x19   :  { %450 = vmatpush3.bf16.msra.mxu1 %v449_v26 }
  0x1a   :  { %451 = vmatprep.subr.bf16.mxu1 %v466_v0 }
  0x1d   :  { %453 = vmatpush3.bf16.msra.mxu1 %v452_v29 }
  0x1e   :  { %454 = vmatprep.subr.bf16.mxu1 %v466_v0 }
  0x21   :  { %456 = vmatpush3.bf16.msra.mxu1 %v455_v32 }
  0xde   :  { %v121_v34 = vpop.f32.mrb[0].mxu0 }
  0xdf   :  { %v122_v35 = vadd.f32 %v342_v33, %v121_v34  ;;  %v384_v36 = vpop.f32.mrb[1].mxu0 }
  0xe1   :  { %v125_v37 = vmax.f32 %v122_v35, 0.0 }
  0xe3   :  { %418 = vmatmul.mubr.f32.vlgmr.msra.gmra.mrb[0].mxu1 %v125_v37 }
 0x1b6   :  { %v215_v39 = vpop.f32.mrb[0].mxu1 }
 0x1b7   :  { %v216_v40 = vadd.f32 %v344_v38, %v215_v39  ;;  %v419_v41 = vpop.f32.mrb[1].mxu1 }
 0x1b9   :  { %v219_v42 = vmul.f32 0.5, %v216_v40  ;;  %333 = vst.msk [vmem:[%s633_s11] sm:$0xff] %vm51_vm1, %v216_v40 }
 0x1bb   :  { %v220_v46 = vmul.f32 1.442695, %v219_v42 }
 0x1bd   :  { %464 = vpow2.f32 %v220_v46 }
 0x1c7   :  { %v465_v47 = vpop.eup %464 }
 0x1c8   :  { %224 = vrot.lane.b32.xlu0 %v465_v47, %s469_s5 }
 0x23a   :  { %v225_v49 = vpop.permute.xlu0 %224 }
 0x23b   :  { %v227_v50 = vmul.f32 %v225_v49, %v222_v48 }
 0x23d   :  { %v228_v51 = vadd.f32 %v227_v50, %v216_v40 }
 0x23f   :  { %425 = vmatmul.mubr.msk.f32.vlgmr.msra.gmra.mrb[2].mxu0 %vm238_vm2, %v228_v51 }
 0x312   :  { %v308_v54 = vpop.f32.mrb[2].mxu0 }
 0x313   :  { %v309_v55 = vadd.f32 %v345_v53, %v308_v54  ;;  %v426_v56 = vpop.f32.mrb[3].mxu0 }
 0x315   :  { %v312_v58 = vmax.f32 %v309_v55, 0.0 }
 0x317   :  { %v320_v59 = vmul.f32 %v347_v57, %v312_v58 }
 0x319   :  { %321 = vadd.xlane.f32.xlu0 %v320_v59 }
 0x3a6   :  { %v322_v61 = vpop.xlane.xlu0 %321 }
 0x3a7   :  { %v330_v62 = vadd.f32 %v348_v60, %v322_v61 }
 0x3a9   :  { %332 = vst.msk [vmem:[%s639_s10] sm:$0xff] %vm331_vm3, %v330_v62 }

</bundles_post_ra>
